<compile_context>
chip_gen: v7x
topology: tpu7x:2x2x1
jax: 0.10.0
libtpu: 0.0.40
codegen_flags: <defaults>
</compile_context>

<pallas_src>
import functools

import jax
import jax.numpy as jnp
from jax.experimental import pallas as pl
from jax.experimental.pallas import tpu as pltpu

NEG_SLOPE = 0.01  # F.leaky_relu default negative_slope
LANE = 128        # TPU vreg lane width


def _leaky_relu(v):
    # max(v, a*v) == leaky_relu for 0 < a < 1; 2 VPU ops instead of cmp+select+mul.
    return jnp.maximum(v, NEG_SLOPE * v)


def _round_up(n, m):
    return ((n + m - 1) // m) * m


def _vmem_budget_bytes():
    """Per-TensorCore VMEM budget with headroom; conservative fallback (v7x = 64 MiB)."""
    try:
        cap = pltpu.get_tpu_info().vmem_capacity_bytes
    except Exception:
        cap = 64 << 20
    return int(0.70 * cap), cap


# ---------------------------------------------------------------------------
# Kernel
# ---------------------------------------------------------------------------
def _box_encoder_kernel(x_ref, wcat_ref, bcat_ref, w2_ref, b2_ref, out_ref,
                        *, hidden_pad):
    # x arrives f32; cast to bf16 on the VPU (slack) right before the MXU push.
    x = x_ref[...].astype(wcat_ref.dtype)                           # [tb, in] bf16
    # Fused (mlp1 || mlp_skip) matmul: one MXU push over hidden_pad+feature_pad lanes.
    y_cat = jnp.dot(x, wcat_ref[...],
                    preferred_element_type=jnp.float32) + bcat_ref[...]   # f32
    h = _leaky_relu(y_cat[:, :hidden_pad])                          # [tb, HP] f32
    skip = y_cat[:, hidden_pad:]                                    # [tb, FP] f32
    # mlp2 branch (bf16 operands, f32 accumulation).
    y2 = jnp.dot(h.astype(w2_ref.dtype), w2_ref[...],
                 preferred_element_type=jnp.float32) + b2_ref[...]
    out = _leaky_relu(skip + y2)                                    # [tb, FP] f32
    # Store only the true feature columns (lane-dense when feature % 128 == 0,
    # masked vst otherwise -- cheaper than 4x HBM writeback + a post-kernel slice).
    out_ref[...] = out[:, :out_ref.shape[1]].astype(out_ref.dtype)


# ---------------------------------------------------------------------------
# Wrapper-side layout prep (one time per parameter set)
# ---------------------------------------------------------------------------
def prepare_box_encoder_params(params, *, lane=LANE):
    """Zero-pad hidden/feature to a multiple of `lane`, fuse w1||wskip along the
    output dim, cast weights to bf16 (biases stay f32 [1, N] rows)."""
    in_size, hidden = params["w1"].shape
    feature = params["wskip"].shape[1]
    HP = _round_up(hidden, lane)
    FP = _round_up(feature, lane)

    w1p = jnp.zeros((in_size, HP), jnp.float32).at[:, :hidden].set(params["w1"])
    wsp = jnp.zeros((in_size, FP), jnp.float32).at[:, :feature].set(params["wskip"])
    w2p = jnp.zeros((HP, FP), jnp.float32).at[:hidden, :feature].set(params["w2"])
    b1p = jnp.zeros((1, HP), jnp.float32).at[0, :hidden].set(params["b1"])
    bsp = jnp.zeros((1, FP), jnp.float32).at[0, :feature].set(params["bskip"])
    b2p = jnp.zeros((1, FP), jnp.float32).at[0, :feature].set(params["b2"])

    return {
        "w_cat": jnp.concatenate([w1p, wsp], axis=1).astype(jnp.bfloat16),  # [in, HP+FP]
        "b_cat": jnp.concatenate([b1p, bsp], axis=1),                       # [1, HP+FP] f32
        "w2": w2p.astype(jnp.bfloat16),                                     # [HP, FP]
        "b2": b2p,                                                          # [1, FP]  f32
        "hidden_pad": HP, "feature_pad": FP,
        "in_size": in_size, "feature": feature,
    }


# ---------------------------------------------------------------------------
# Tile / padding / VMEM accounting
# ---------------------------------------------------------------------------
def _choose_tile_and_pad(B, in_size, HP, FP, feature, budget):
    """Pick batch tile (multiple of 8) whose full footprint (pipeline buffers,
    single-buffered weights, f32 intermediates, slack) fits the VMEM budget,
    then pad the batch to a multiple of the tile (even grid for 2-TC split)."""
    def footprint(tb):
        return (
            2 * tb * in_size * 4            # x tiles (f32), double-buffered
            + 2 * tb * feature * 4          # out tiles (f32), double-buffered
            + (in_size * (HP + FP) + HP * FP) * 2   # bf16 weights, Buffered(1)
            + ((HP + FP) + FP) * 4          # f32 biases, Buffered(1)
            + tb * in_size * 2              # in-kernel bf16 x copy
            + tb * (HP + FP) * 4            # y_cat f32
            + tb * HP * 4                   # h f32
            + tb * HP * 2                   # h bf16 copy
            + tb * FP * 4                   # y2 / out f32
            + (2 << 20)                     # Mosaic scratch slack
        )

    tb = 8
    for cand in (1024, 512, 256, 128, 64, 32, 16, 8):
        if footprint(cand) <= budget:
            tb = cand
            break
    # Don't over-pad tiny batches: shrink toward the actual batch size.
    min_rows = _round_up(max(B, 8), 8)
    while tb > 8 and tb >= 2 * min_rows:
        tb //= 2

    Bp = _round_up(max(B, tb), tb)
    grid = Bp // tb
    # Even grid length -> clean split across the 2 TensorCores on v7x.
    if grid > 1 and grid % 2 == 1:
        Bp += tb
        grid += 1
    return tb, Bp, footprint(tb)


def _const_spec(shape):
    """BlockSpec for a grid-invariant (resident) input; single VMEM buffer."""
    idx = lambda i: (0,) * len(shape)
    try:
        return pl.BlockSpec(shape, idx, pipeline_mode=pl.Buffered(1))
    except TypeError:  # older JAX without pipeline_mode kwarg
        return pl.BlockSpec(shape, idx)


# ---------------------------------------------------------------------------
# Forward
# ---------------------------------------------------------------------------
def box_encoder(x, prep, *, tile_b=None):
    """Fused BoxEncoder forward.  x: [B, in_size] f32.  prep: prepare_box_encoder_params()."""
    B, in_size = x.shape
    assert in_size == prep["in_size"]
    HP, FP = prep["hidden_pad"], prep["feature_pad"]
    feature = prep["feature"]

    budget, vmem_cap = _vmem_budget_bytes()
    if tile_b is not None:
        assert tile_b % 8 == 0
        tb = tile_b
        Bp = _round_up(max(B, tb), tb)
        footprint = budget  # user override: trust the caller
    else:
        tb, Bp, footprint = _choose_tile_and_pad(B, in_size, HP, FP, feature, budget)

    # Pad the batch (rows of zeros) in one op; x stays f32 (cast happens in-kernel).
    if Bp != B:
        x = jnp.zeros((Bp, in_size), x.dtype).at[:B, :].set(x)

    grid = (Bp // tb,)

    vmem_limit = int(min(max(footprint + (4 << 20), 32 << 20), int(0.9 * vmem_cap)))

    kernel = functools.partial(_box_encoder_kernel, hidden_pad=HP)

    # TODO(synk): for very large hidden/feature (resident bf16 weights > ~16 MiB on
    # v7x) add a second grid axis tiling FP; and consider pltpu.CORE_PARALLEL on the
    # batch axis for explicit 2-TC scheduling.
    out_padded = pl.pallas_call(
        kernel,
        out_shape=jax.ShapeDtypeStruct((Bp, feature), jnp.float32),
        grid_spec=pltpu.PrefetchScalarGridSpec(
            num_scalar_prefetch=0,
            grid=grid,
            in_specs=[
                pl.BlockSpec((tb, in_size), lambda i: (i, 0)),   # x tile (f32)
                _const_spec((in_size, HP + FP)),                 # w1 || wskip (bf16)
                _const_spec((1, HP + FP)),                       # b1 || bskip (f32)
                _const_spec((HP, FP)),                           # w2 (bf16)
                _const_spec((1, FP)),                            # b2 (f32)
            ],
            out_specs=pl.BlockSpec((tb, feature), lambda i: (i, 0)),
        ),
        compiler_params=pltpu.CompilerParams(
            dimension_semantics=("parallel",),
            vmem_limit_bytes=vmem_limit),
    )(x, prep["w_cat"], prep["b_cat"], prep["w2"], prep["b2"])

    # Only the batch padding (if any) needs stripping; feature dim is exact.
    return out_padded[:B] if Bp != B else out_padded


# ---------------------------------------------------------------------------
# Init + pure-JAX reference (matches the PyTorch forward)
# ---------------------------------------------------------------------------
def init_params(key, in_size, feature_size, hidden_size):
    """Deterministic init mimicking nn.Linear's U(-1/sqrt(fan_in), 1/sqrt(fan_in)).
    Weights are stored transposed: [fan_in, fan_out]."""
    ks = jax.random.split(key, 6)

    def lin(kw, kb, fan_in, fan_out):
        bound = 1.0 / jnp.sqrt(fan_in)
        w = jax.random.uniform(kw, (fan_in, fan_out), jnp.float32, -bound, bound)
        b = jax.random.uniform(kb, (fan_out,), jnp.float32, -bound, bound)
        return w, b

    wskip, bskip = lin(ks[0], ks[1], in_size, feature_size)
    w1, b1 = lin(ks[2], ks[3], in_size, hidden_size)
    w2, b2 = lin(ks[4], ks[5], hidden_size, feature_size)
    return {"wskip": wskip, "bskip": bskip, "w1": w1, "b1": b1,
            "w2": w2, "b2": b2}


def box_encoder_ref(x, p):
    h = jax.nn.leaky_relu(x @ p["w1"] + p["b1"], NEG_SLOPE)
    return jax.nn.leaky_relu(x @ p["wskip"] + p["bskip"] + h @ p["w2"] + p["b2"],
                             NEG_SLOPE)


if __name__ == "__main__":
    key = jax.random.PRNGKey(0)
    k_x, k_p = jax.random.split(key)

    B, in_size, feature_size, hidden_size = 16, 8, 32, 32
    x = jax.random.normal(k_x, (B, in_size), jnp.float32)
    params = init_params(k_p, in_size, feature_size, hidden_size)
    prep = prepare_box_encoder_params(params)

    out = box_encoder(x, prep)
    out = jax.block_until_ready(out)

    ref = box_encoder_ref(x, params)
    assert out.shape == (B, feature_size)
    # bf16 MXU operands (f32 accumulation) vs pure-f32 reference -> loosened tolerance.
    assert jnp.allclose(out, ref, atol=5e-2, rtol=5e-2), "mismatch vs reference"

    print("KERNEL_OK")
</pallas_src>

<mosaic_0001>
module attributes {stable_mosaic.version = 11 : i64} {
  func.func @_box_encoder_kernel(%arg0: i32, %arg1: memref<16x8xf32, #tpu.memory_space<vmem>>, %arg2: memref<8x256xbf16, #tpu.memory_space<vmem>>, %arg3: memref<1x256xf32, #tpu.memory_space<vmem>>, %arg4: memref<128x128xbf16, #tpu.memory_space<vmem>>, %arg5: memref<1x128xf32, #tpu.memory_space<vmem>>, %arg6: memref<16x32xf32, #tpu.memory_space<vmem>>) attributes {dimension_semantics = [#tpu.dimension_semantics<parallel>], iteration_bounds = array<i64: 1>, scalar_prefetch = 0 : i64, scratch_operands = 0 : i64, tpu.core_type = #tpu.core_type<tc>, window_params = [{transform_indices = @transform_0, window_bounds = array<i64: 16, 8>}, {pipeline_mode = #tpu.pipeline_mode<synchronous>, transform_indices = @transform_1, window_bounds = array<i64: 8, 256>}, {pipeline_mode = #tpu.pipeline_mode<synchronous>, transform_indices = @transform_2, window_bounds = array<i64: 1, 256>}, {pipeline_mode = #tpu.pipeline_mode<synchronous>, transform_indices = @transform_3, window_bounds = array<i64: 128, 128>}, {pipeline_mode = #tpu.pipeline_mode<synchronous>, transform_indices = @transform_4, window_bounds = array<i64: 1, 128>}, {transform_indices = @transform_5, window_bounds = array<i64: 16, 32>}]} {
    %c0 = arith.constant 0 : index
    %c0_0 = arith.constant 0 : index
    %0 = vector.load %arg1[%c0, %c0_0] : memref<16x8xf32, #tpu.memory_space<vmem>>, vector<16x8xf32>
    %1 = arith.truncf %0 : vector<16x8xf32> to vector<16x8xbf16>
    %c0_1 = arith.constant 0 : index
    %c0_2 = arith.constant 0 : index
    %2 = vector.load %arg2[%c0_1, %c0_2] : memref<8x256xbf16, #tpu.memory_space<vmem>>, vector<8x256xbf16>
    %cst = arith.constant dense<0.000000e+00> : vector<16x256xf32>
    %3 = tpu.matmul %1, %2, %cst {dimension_numbers = #tpu.dot_dimension_numbers<[1], [0], [0], [1], [0, 0, 1, 1], [], []>} : vector<16x8xbf16>, vector<8x256xbf16>, vector<16x256xf32> -> vector<16x256xf32>
    %c0_3 = arith.constant 0 : index
    %c0_4 = arith.constant 0 : index
    %4 = vector.load %arg3[%c0_3, %c0_4] : memref<1x256xf32, #tpu.memory_space<vmem>>, vector<1x256xf32>
    %5 = vector.broadcast %4 : vector<1x256xf32> to vector<16x256xf32>
    %6 = arith.addf %3, %5 : vector<16x256xf32>
    %7 = vector.extract_strided_slice %6 {offsets = [0, 0], sizes = [16, 128], strides = [1, 1]} : vector<16x256xf32> to vector<16x128xf32>
    %cst_5 = arith.constant 0.00999999977 : f32
    %8 = vector.broadcast %cst_5 : f32 to vector<16x128xf32>
    %9 = arith.mulf %8, %7 : vector<16x128xf32>
    %10 = arith.maximumf %7, %9 : vector<16x128xf32>
    %11 = vector.extract_strided_slice %6 {offsets = [0, 128], sizes = [16, 128], strides = [1, 1]} : vector<16x256xf32> to vector<16x128xf32>
    %12 = arith.truncf %10 : vector<16x128xf32> to vector<16x128xbf16>
    %c0_6 = arith.constant 0 : index
    %c0_7 = arith.constant 0 : index
    %13 = vector.load %arg4[%c0_6, %c0_7] : memref<128x128xbf16, #tpu.memory_space<vmem>>, vector<128x128xbf16>
    %cst_8 = arith.constant dense<0.000000e+00> : vector<16x128xf32>
    %14 = tpu.matmul %12, %13, %cst_8 {dimension_numbers = #tpu.dot_dimension_numbers<[1], [0], [0], [1], [0, 0, 1, 1], [], []>} : vector<16x128xbf16>, vector<128x128xbf16>, vector<16x128xf32> -> vector<16x128xf32>
    %c0_9 = arith.constant 0 : index
    %c0_10 = arith.constant 0 : index
    %15 = vector.load %arg5[%c0_9, %c0_10] : memref<1x128xf32, #tpu.memory_space<vmem>>, vector<1x128xf32>
    %16 = vector.broadcast %15 : vector<1x128xf32> to vector<16x128xf32>
    %17 = arith.addf %14, %16 : vector<16x128xf32>
    %18 = arith.addf %11, %17 : vector<16x128xf32>
    %cst_11 = arith.constant 0.00999999977 : f32
    %19 = vector.broadcast %cst_11 : f32 to vector<16x128xf32>
    %20 = arith.mulf %19, %18 : vector<16x128xf32>
    %21 = arith.maximumf %18, %20 : vector<16x128xf32>
    %22 = vector.extract_strided_slice %21 {offsets = [0, 0], sizes = [16, 32], strides = [1, 1]} : vector<16x128xf32> to vector<16x32xf32>
    %c0_12 = arith.constant 0 : index
    %c0_13 = arith.constant 0 : index
    %23 = vector.load %arg6[%c0_12, %c0_13] : memref<16x32xf32, #tpu.memory_space<vmem>>, vector<16x32xf32>
    tpu.vector_store %arg6[%c0_12, %c0_13], %22 {strides = array<i32>} : memref<16x32xf32, #tpu.memory_space<vmem>>, vector<16x32xf32>,
    return
  }
  func.func @transform_0(%arg0: i32) -> (i32, i32) {
    %c0_i32 = arith.constant 0 : i32
    %c0_i32_0 = arith.constant 0 : i32
    return %arg0, %c0_i32 : i32, i32
  }
  func.func @transform_1(%arg0: i32) -> (i32, i32) {
    %c0_i32 = arith.constant 0 : i32
    %c0_i32_0 = arith.constant 0 : i32
    %c0_i32_1 = arith.constant 0 : i32
    return %c0_i32, %c0_i32_0 : i32, i32
  }
  func.func @transform_2(%arg0: i32) -> (i32, i32) {
    %c0_i32 = arith.constant 0 : i32
    %c0_i32_0 = arith.constant 0 : i32
    %c0_i32_1 = arith.constant 0 : i32
    return %c0_i32, %c0_i32_0 : i32, i32
  }
  func.func @transform_3(%arg0: i32) -> (i32, i32) {
    %c0_i32 = arith.constant 0 : i32
    %c0_i32_0 = arith.constant 0 : i32
    %c0_i32_1 = arith.constant 0 : i32
    return %c0_i32, %c0_i32_0 : i32, i32
  }
  func.func @transform_4(%arg0: i32) -> (i32, i32) {
    %c0_i32 = arith.constant 0 : i32
    %c0_i32_0 = arith.constant 0 : i32
    %c0_i32_1 = arith.constant 0 : i32
    return %c0_i32, %c0_i32_0 : i32, i32
  }
  func.func @transform_5(%arg0: i32) -> (i32, i32) {
    %c0_i32 = arith.constant 0 : i32
    %c0_i32_0 = arith.constant 0 : i32
    return %arg0, %c0_i32 : i32, i32
  }
}

</mosaic_0001>

<bundles_post_ra>
// kernel: tpu_custom_call.1
= control target key start
LH: loop header
LB: loop body
LE: loop exit
PB: predicated region body
PF: predicated region fallthrough
CT: control target
= control target key end

     0   :  { %10 = vsyncpa [#allocation3], 0  ;;  %s441_s0 = inlined_call_operand.vmem [shape: f32[16,8], index: 0, kind: input, shape index: {}]   ;;  %s442_s1 = inlined_call_operand.vmem [shape: bf16[8,256], index: 1, kind: input, shape index: {}]   ;;  %s443_s2 = inlined_call_operand.vmem [shape: f32[1,256], index: 2, kind: input, shape index: {}]   ;;  %s444_s3 = inlined_call_operand.hbm [shape: bf16[128,128], index: 3, kind: input, shape index: {}]   ;;  %s445_s4 = inlined_call_operand.vmem [shape: f32[1,128], index: 4, kind: input, shape index: {}]   ;;  %s446_s5 = inlined_call_operand.hbm [shape: f32[16,32], index: 5, kind: output, shape index: {}]  }
   0x1   :  { %11 = vsyncpa [#allocation4], 0  ;;  %s363_s18 = smov [#allocation2]   ;;  %s315_s22 = scalar_lea.hbm %s444_s3, 1024 }
   0x2   :  { %s23_s19 = sshll.u32 %s363_s18, 4  ;;  %p316_p0 = scmp.ne.s32.totalorder %s444_s3, %s315_s22  ;;  %s24_s19 = int_to_ptr.vmem [resolvable:$true] %s23_s19 }
   0x3   :  { %p319_p1 = scmp.lt.u32.totalorder %s315_s22, %s444_s3 }
   0x5   :  { %p321_p2 = pnand %p319_p1, %p316_p0 }
   0x7   :  { %324 = shalt.err (!%p321_p2)
}
   0x8   :  { %s325_s27 = scalar_lea.vmem %s24_s19, 1024  ;;  %p330_p4 = scmp.lt.s32.totalorder %s24_s19, %s24_s19 }
   0x9   :  { %p326_p3 = scmp.ne.s32.totalorder %s24_s19, %s325_s27  ;;  %p331_p5 = scmp.lt.s32.totalorder %s325_s27, %s325_s27 }
   0xb   :  { %p332_p6 = por %p331_p5, %p330_p4 }
   0xd   :  { %p333_p7 = pnand %p332_p6, %p326_p3 }
   0xf   :  { %336 = shalt.err (!%p333_p7)
}
  0x10   :  { %s364_s28 = smov 64   ;;  %s365_s29 = smov 4  }
  0x11   :  { %29 = dma.hbm_to_vmem [thread:$0]  %s444_s3, 1024, %s24_s19, [#allocation3], %s364_s28, %s364_s28, %s365_s29  }
  0x12   :  { %359 = dma.done.wait [#allocation3], 1024  }
  0x13   :  { %360 = vsyncadd [#allocation3], 4294966272  ;;  %v366_v0 = vmov 0   ;;  %v367_v1 = vmov 0.0   ;;  %v39_v2 = vld [vmem:[%s442_s1] sm:$0xff]  ;;  %vm61_vm0 = vcmask 1043456   ;;  %v42_v17 = vlaneseq }
  0x14   :  { %100 = vmatprep.mubr.bf16.mxu0 %v366_v0  ;;  %276 = vmatprep.subr.bf16.mxu1 %v367_v1  ;;  %v36_v3 = vld [vmem:[%s441_s0] sm:$0xff]  ;;  %v37_v4 = vld [vmem:[%s441_s0 + $0x8] sm:$0xff]  ;;  %v255_v5 = vcombine.high %v39_v2, %v39_v2  ;;  %v254_v6 = vcombine.low %v39_v2, %v39_v2  ;;  %vm57_vm1 = vcmask 64512   ;;  %v309_v11 = vld [vmem:[#allocation2 + $0x10] sm:$0xff]   ;;  %vm368_vm2 = vmmov 0  }
  0x15   :  { %v307_v7 = vld [vmem:[#allocation2] sm:$0xff]   ;;  %v38_v9 = vpack.c.bf16 %v37_v4, %v36_v3  ;;  %v308_v10 = vld [vmem:[#allocation2 + $0x8] sm:$0xff]   ;;  %v310_v12 = vld [vmem:[#allocation2 + $0x18] sm:$0xff]   ;;  %292 = vmatprep.mubr.msk.bf16.mxu1 %vm368_vm2, %v367_v1  ;;  %v43_v18 = vshrl.u32 %v42_v17, 7  ;;  %vm234_vm3 = vcmask 261120  }
  0x16   :  { %256 = vmatprep.subr.msk.bf16.mxu0 %vm61_vm0, %v255_v5  ;;  %v63_v8 = vsel %vm61_vm0, %v254_v6, 0  ;;  %277 = vmatpush3.bf16.msra.mxu1 %v307_v7  ;;  %v311_v13 = vld [vmem:[#allocation2 + $0x20] sm:$0xff]   ;;  %v312_v14 = vld [vmem:[#allocation2 + $0x28] sm:$0xff]   ;;  %v313_v15 = vld [vmem:[#allocation2 + $0x30] sm:$0xff]  }
  0x17   :  { %69 = vmatpush1.bf16.msra.mxu0 %v63_v8  ;;  %278 = vmatprep.subr.bf16.mxu1 %v367_v1  ;;  %v314_v16 = vld [vmem:[#allocation2 + $0x38] sm:$0xff]   ;;  %v44_v19 = vsub.s32 0, %v43_v18  ;;  %v40_v20 = vld [vmem:[%s443_s2] sm:$0x3]  ;;  %v48_v33 = vsub.s32 1, %v43_v18  ;;  %s369_s2 = smov [#allocation5]  }
  0x18   :  { %v258_v35 = vld [vmem:[%s445_s4] ss:$0 sm:$0xff]  ;;  %s242_s14 = sshll.u32 %s369_s2, 4  ;;  %s243_s14 = int_to_ptr.vmem [resolvable:$true] %s242_s14 }
  0x19   :  { %v45_v21 = vrot.slane %v40_v20, %v44_v19  ;;  %v49_v34 = vrot.slane %v40_v20, %v48_v33  ;;  %s337_s4 = scalar_lea.vmem %s243_s14, 256  ;;  %p342_p9 = scmp.lt.s32.totalorder %s243_s14, %s243_s14 }
  0x1a   :  { %257 = vmatmul.mubr.msk.bf16.vlgmr.msra.gmra.mrb[0].mxu0 %vm57_vm1, %v38_v9  ;;  %279 = vmatpush3.bf16.msra.mxu1 %v308_v10  ;;  %p338_p8 = scmp.ne.s32.totalorder %s243_s14, %s337_s4  ;;  %p343_p10 = scmp.lt.s32.totalorder %s337_s4, %s337_s4 }
  0x1b   :  { %280 = vmatprep.subr.bf16.mxu1 %v367_v1 }
  0x1c   :  { %p344_p11 = por %p343_p10, %p342_p9 }
  0x1e   :  { %281 = vmatpush3.bf16.msra.mxu1 %v309_v11  ;;  %p345_p12 = pnand %p344_p11, %p338_p8 }
  0x1f   :  { %282 = vmatprep.subr.bf16.mxu1 %v367_v1 }
  0x22   :  { %283 = vmatpush3.bf16.msra.mxu1 %v310_v12 }
  0x23   :  { %284 = vmatprep.subr.bf16.mxu1 %v367_v1 }
  0x26   :  { %285 = vmatpush3.bf16.msra.mxu1 %v311_v13 }
  0x27   :  { %286 = vmatprep.subr.bf16.mxu1 %v367_v1 }
  0x2a   :  { %287 = vmatpush3.bf16.msra.mxu1 %v312_v14 }
  0x2b   :  { %288 = vmatprep.subr.bf16.mxu1 %v367_v1 }
  0x2e   :  { %289 = vmatpush3.bf16.msra.mxu1 %v313_v15 }
  0x2f   :  { %290 = vmatprep.subr.bf16.mxu1 %v367_v1 }
  0x32   :  { %291 = vmatpush3.bf16.msra.mxu1 %v314_v16 }
  0xed   :  { %v102_v22 = vpop.f32.mrb[0].mxu0 }
  0xee   :  { %v103_v23 = vadd.f32 %v102_v22, %v45_v21  ;;  %v104_v24 = vpop.f32.mrb[1].mxu0 }
  0xef   :  { %v106_v25 = vpop.f32.mrb[2].mxu0  ;;  %v105_v37 = vadd.f32 %v104_v24, %v49_v34 }
  0xf0   :  { %v111_v26 = vmul.f32 0.01, %v103_v23  ;;  %v107_v27 = vadd.f32 %v106_v25, %v45_v21  ;;  %v108_v28 = vpop.f32.mrb[3].mxu0 }
  0xf1   :  { %v109_v41 = vadd.f32 %v108_v28, %v49_v34 }
  0xf2   :  { %v112_v29 = vmul.f32 0.01, %v107_v27  ;;  %v113_v30 = vmax.f32 %v103_v23, %v111_v26 }
  0xf4   :  { %v114_v31 = vmax.f32 %v107_v27, %v112_v29 }
  0xf6   :  { %v115_v32 = vpack.c.bf16 %v114_v31, %v113_v30 }
  0xf8   :  { %293 = vmatmul.mubr.bf16.vlgmr.msra.gmra.mrb[0].mxu1 %v115_v32 }
 0x1cb   :  { %v221_v36 = vpop.f32.mrb[0].mxu1 }
 0x1cc   :  { %v222_v38 = vadd.f32 %v258_v35, %v221_v36  ;;  %v294_v39 = vpop.f32.mrb[1].mxu1 }
 0x1cd   :  { %v224_v40 = vpop.f32.mrb[2].mxu1 }
 0x1ce   :  { %v228_v42 = vadd.f32 %v222_v38, %v105_v37  ;;  %v225_v43 = vadd.f32 %v258_v35, %v224_v40  ;;  %v295_v44 = vpop.f32.mrb[3].mxu1 }
 0x1d0   :  { %v230_v45 = vmul.f32 0.01, %v228_v42  ;;  %v229_v46 = vadd.f32 %v225_v43, %v109_v41 }
 0x1d2   :  { %v232_v47 = vmax.f32 %v228_v42, %v230_v45  ;;  %v231_v48 = vmul.f32 0.01, %v229_v46 }
 0x1d4   :  { %v233_v49 = vmax.f32 %v229_v46, %v231_v48  ;;  %235 = vst.msk [vmem:[#allocation5] sm:$0xff] %vm234_vm3, %v232_v47 }
 0x1d6   :  { %236 = vst.msk [vmem:[#allocation5 + $0x8] sm:$0xff] %vm234_vm3, %v233_v49 }
 0x1d7   :  { %348 = shalt.err (!%p345_p12)
}
 0x1d8   :  { %s349_s17 = scalar_lea.hbm %s446_s5, 256 }
 0x1d9   :  { %p350_p13 = scmp.ne.s32.totalorder %s446_s5, %s349_s17  ;;  %p353_p0 = scmp.lt.u32.totalorder %s349_s17, %s446_s5 }
 0x1db   :  { %p355_p1 = pnand %p353_p0, %p350_p13 }
 0x1dd   :  { %358 = shalt.err (!%p355_p1)
}
 0x1de   :  { %s370_s22 = smov 128   ;;  %s371_s23 = smov 8  }
 0x1df   :  { %248 = dma.vmem_to_hbm [thread:$0]  %s243_s14, 256, %s446_s5, [#allocation4], %s370_s22, %s370_s22, %s371_s23  }
 0x1e0   :  { %361 = dma.done.wait [#allocation4], 256  }
 0x1e1   :  { %362 = vsyncadd [#allocation4], 4294967040 }
 0x1e2   :  { %252 = vsyncpa [#allocation3], 1 }
 0x1e3   :  { %253 = vsyncpa [#allocation4], 1 }

</bundles_post_ra>
